<compile_context>
chip_gen: v7x
topology: tpu7x:2x2x1
jax: 0.10.0
libtpu: 0.0.40
codegen_flags: <defaults>
</compile_context>

<pallas_src>
import functools
import math

import jax
import jax.numpy as jnp
from jax.experimental import pallas as pl
from jax.experimental.pallas import tpu as pltpu

LANE = 128       # feature dims padded to multiples of the TPU lane width
TM_NODES = 512   # node-row tile (output rows of the aggregation)
TK_NODES = 512   # node-column tile (reduction axis of the aggregation)


def _round_up(n, m):
    return ((n + m - 1) // m) * m


def _vmem_limit_bytes():
    """Generation-aware scoped-VMEM request (v7x: 64 MiB physical, v5e/v6e: 128 MiB)."""
    cap = 64 * 1024 * 1024
    try:
        cap = int(pltpu.get_tpu_info().vmem_capacity_bytes)
    except Exception:
        pass
    return max(32 * 1024 * 1024, min(cap - 16 * 1024 * 1024, 96 * 1024 * 1024))


def _compiler_params(dimension_semantics):
    return pltpu.CompilerParams(
        dimension_semantics=dimension_semantics,
        vmem_limit_bytes=_vmem_limit_bytes(),
    )


def _spec(shape, index_map, buffers=None):
    """BlockSpec helper: requests deeper pipelining where the jax version supports it."""
    if buffers is not None:
        try:
            return pl.BlockSpec(shape, index_map, pipeline_mode=pl.Buffered(buffers))
        except Exception:
            pass
    return pl.BlockSpec(shape, index_map)


# ----------------------------- Pallas kernels ------------------------------ #

def _proj_kernel(x_ref, wl_ref, wr_ref, b_ref, xl_ref, xr_ref):
    """Per-layer pre-projection: xl = x @ Wl + b (f32), xr = x @ Wr (bf16)."""
    x = x_ref[...]
    xl = jnp.dot(x, wl_ref[...], preferred_element_type=jnp.float32) + b_ref[...]
    xr = jnp.dot(x, wr_ref[...], preferred_element_type=jnp.float32)
    xl_ref[...] = xl.astype(xl_ref.dtype)
    xr_ref[...] = xr.astype(xr_ref.dtype)


def _accumulate(adj_ref, xr_ref, acc_ref):
    """acc += mask_tile @ xr_tile, skipping the zero-init pass at k == 0."""
    k = pl.program_id(1)
    # int8 0/1 mask -> bf16 for the MXU (two-step cast keeps the lowering simple; the
    # VPU cast rides in otherwise idle slots of this HBM-bound kernel).
    a = adj_ref[...].astype(jnp.float32).astype(jnp.bfloat16)
    contrib = jnp.dot(a, xr_ref[...], preferred_element_type=jnp.float32)

    @pl.when(k == 0)
    def _first():
        acc_ref[...] = contrib

    @pl.when(k != 0)
    def _rest():
        acc_ref[...] += contrib


def _norm_relu(h):
    """relu(L2-row-normalize(h)), rsqrt on the EUP slot (== h / max(||h||, 1e-12))."""
    sumsq = jnp.sum(h * h, axis=-1, keepdims=True)
    h = h * jax.lax.rsqrt(jnp.maximum(sumsq, 1e-24))
    return jnp.maximum(h, 0.0)


def _sage_agg_kernel(adj_ref, xr_ref, xl_ref, invdeg_ref, o_ref, acc_ref):
    """One GraphSage layer (mean aggregation + combine + L2 norm + ReLU)."""
    _accumulate(adj_ref, xr_ref, acc_ref)

    @pl.when(pl.program_id(1) == pl.num_programs(1) - 1)
    def _finalize():
        h = xl_ref[...] + invdeg_ref[...] * acc_ref[...]
        o_ref[...] = _norm_relu(h).astype(o_ref.dtype)


def _sage_agg_last_kernel(adj_ref, xr_ref, xl_ref, invdeg_ref,
                          w1_ref, b1_ref, w2_ref, b2_ref, o_ref, acc_ref, *, out_dim):
    """Last GraphSage layer fused with post_mp (Linear->Dropout->Linear) + log_softmax."""
    _accumulate(adj_ref, xr_ref, acc_ref)

    @pl.when(pl.program_id(1) == pl.num_programs(1) - 1)
    def _finalize():
        h = _norm_relu(xl_ref[...] + invdeg_ref[...] * acc_ref[...])
        # post_mp: Linear -> Dropout (identity in eval) -> Linear
        h1 = jnp.dot(h.astype(jnp.bfloat16), w1_ref[...],
                     preferred_element_type=jnp.float32) + b1_ref[...]
        logits = jnp.dot(h1.astype(jnp.bfloat16), w2_ref[...],
                         preferred_element_type=jnp.float32) + b2_ref[...]
        # mask lane padding so it does not perturb the softmax
        col = jax.lax.broadcasted_iota(jnp.int32, logits.shape, 1)
        logits = jnp.where(col < out_dim, logits, -1e30)
        m = jnp.max(logits, axis=-1, keepdims=True)
        z = logits - m
        lse = jnp.log(jnp.sum(jnp.exp(z), axis=-1, keepdims=True))
        o_ref[...] = (z - lse).astype(o_ref.dtype)


# ------------------------------ host wrappers ------------------------------ #

def sage_project(x, wl, wr, b):
    np_, fp = x.shape
    hp = wl.shape[1]
    cost = pl.CostEstimate(
        flops=int(2 * 2 * np_ * fp * hp),
        transcendentals=0,
        bytes_accessed=int(x.nbytes + wl.nbytes + wr.nbytes + b.nbytes
                           + np_ * hp * (4 + 2)),
    )
    return pl.pallas_call(
        _proj_kernel,
        out_shape=(jax.ShapeDtypeStruct((np_, hp), jnp.float32),    # xl (includes bias)
                   jax.ShapeDtypeStruct((np_, hp), jnp.bfloat16)),  # xr
        grid_spec=pltpu.PrefetchScalarGridSpec(
            num_scalar_prefetch=0,
            grid=(np_ // TM_NODES,),
            in_specs=[
                pl.BlockSpec((TM_NODES, fp), lambda i: (i, 0)),
                pl.BlockSpec(wl.shape, lambda i: (0, 0)),
                pl.BlockSpec(wr.shape, lambda i: (0, 0)),
                pl.BlockSpec(b.shape, lambda i: (0, 0)),
            ],
            out_specs=[
                pl.BlockSpec((TM_NODES, hp), lambda i: (i, 0)),
                pl.BlockSpec((TM_NODES, hp), lambda i: (i, 0)),
            ],
        ),
        compiler_params=_compiler_params(("parallel",)),
        cost_estimate=cost,
    )(x, wl, wr, b)


def sage_aggregate(adj_i8, xr, xl, inv_deg):
    np_ = adj_i8.shape[0]
    hp = xr.shape[1]
    cost = pl.CostEstimate(
        flops=int(2 * np_ * np_ * hp),
        transcendentals=int(np_),
        bytes_accessed=int(adj_i8.nbytes + xl.nbytes + inv_deg.nbytes
                           + xr.nbytes * (np_ // TM_NODES)   # xr re-read per row tile
                           + np_ * hp * 2),
    )
    return pl.pallas_call(
        _sage_agg_kernel,
        out_shape=jax.ShapeDtypeStruct((np_, hp), jnp.bfloat16),
        grid_spec=pltpu.PrefetchScalarGridSpec(
            num_scalar_prefetch=0,
            grid=(np_ // TM_NODES, np_ // TK_NODES),
            in_specs=[
                _spec((TM_NODES, TK_NODES), lambda i, k: (i, k), buffers=3),  # adjacency mask
                _spec((TK_NODES, hp), lambda i, k: (k, 0), buffers=3),        # projected neighbours
                pl.BlockSpec((TM_NODES, hp), lambda i, k: (i, 0)),            # projected self + bias
                pl.BlockSpec((TM_NODES, 1), lambda i, k: (i, 0)),             # exact 1/deg row scale
            ],
            out_specs=pl.BlockSpec((TM_NODES, hp), lambda i, k: (i, 0)),
            scratch_shapes=[pltpu.VMEM((TM_NODES, hp), jnp.float32)],
        ),
        compiler_params=_compiler_params(("parallel", "arbitrary")),
        cost_estimate=cost,
    )(adj_i8, xr, xl, inv_deg)


def sage_aggregate_last(adj_i8, xr, xl, inv_deg, w1, b1, w2, b2, out_dim):
    np_ = adj_i8.shape[0]
    hp = xr.shape[1]
    outp = w2.shape[1]
    cost = pl.CostEstimate(
        flops=int(2 * np_ * np_ * hp + 2 * np_ * w1.shape[0] * w1.shape[1]
                  + 2 * np_ * hp * outp),
        transcendentals=int(np_ * (1 + outp)),
        bytes_accessed=int(adj_i8.nbytes + xl.nbytes + inv_deg.nbytes
                           + xr.nbytes * (np_ // TM_NODES)
                           + w1.nbytes + w2.nbytes + np_ * outp * 4),
    )
    kernel = functools.partial(_sage_agg_last_kernel, out_dim=out_dim)
    return pl.pallas_call(
        kernel,
        out_shape=jax.ShapeDtypeStruct((np_, outp), jnp.float32),
        grid_spec=pltpu.PrefetchScalarGridSpec(
            num_scalar_prefetch=0,
            grid=(np_ // TM_NODES, np_ // TK_NODES),
            in_specs=[
                _spec((TM_NODES, TK_NODES), lambda i, k: (i, k), buffers=3),
                _spec((TK_NODES, hp), lambda i, k: (k, 0), buffers=3),
                pl.BlockSpec((TM_NODES, hp), lambda i, k: (i, 0)),
                pl.BlockSpec((TM_NODES, 1), lambda i, k: (i, 0)),
                pl.BlockSpec(w1.shape, lambda i, k: (0, 0)),   # post_mp[0] weight
                pl.BlockSpec(b1.shape, lambda i, k: (0, 0)),   # post_mp[0] bias
                pl.BlockSpec(w2.shape, lambda i, k: (0, 0)),   # post_mp[2] weight
                pl.BlockSpec(b2.shape, lambda i, k: (0, 0)),   # post_mp[2] bias
            ],
            out_specs=pl.BlockSpec((TM_NODES, outp), lambda i, k: (i, 0)),
            scratch_shapes=[pltpu.VMEM((TM_NODES, hp), jnp.float32)],
        ),
        compiler_params=_compiler_params(("parallel", "arbitrary")),
        cost_estimate=cost,
    )(adj_i8, xr, xl, inv_deg, w1, b1, w2, b2)


def gnnstack_forward(x, adj_mask_i8, inv_deg, params, output_dim):
    """Full GNNStack forward (emb=False -> log-probs), eval mode."""
    # TODO(synk): for graphs whose int8 mask fits VMEM, fuse all layers into one
    # pallas_call so the adjacency is DMA'd from HBM once instead of num_layers times.
    n, f = x.shape
    np_ = adj_mask_i8.shape[0]
    fp = _round_up(f, LANE)
    h = jnp.zeros((np_, fp), jnp.bfloat16).at[:n, :f].set(x.astype(jnp.bfloat16))

    convs = params["convs"]
    out_p = None
    for layer_idx, (wl, wr, b) in enumerate(convs):
        xl, xr = sage_project(h, wl, wr, b)
        if layer_idx + 1 < len(convs):
            h = sage_aggregate(adj_mask_i8, xr, xl, inv_deg)
        else:
            w1, b1, w2, b2 = params["post_mp"]
            out_p = sage_aggregate_last(adj_mask_i8, xr, xl, inv_deg,
                                        w1, b1, w2, b2, output_dim)
    return out_p[:n, :output_dim]


# ------------------------------- param setup -------------------------------- #

def init_params(key, input_dim, hidden_dim, output_dim, num_layers, heads=1):
    """Returns (packed, raw): packed = lane-padded kernel params, raw = f32 reference."""
    hdim = heads * hidden_dim
    hp = _round_up(hidden_dim, LANE)
    hp_in = _round_up(hdim, LANE)
    outp = _round_up(output_dim, LANE)

    packed = {"convs": [], "post_mp": None}
    raw = {"convs": [], "post_mp": None}

    in_dim, in_pad = input_dim, _round_up(input_dim, LANE)
    for _ in range(num_layers):
        key, k1, k2, k3 = jax.random.split(key, 4)
        wl = 0.1 * jax.random.normal(k1, (in_dim, hidden_dim), jnp.float32)
        wr = 0.1 * jax.random.normal(k2, (in_dim, hidden_dim), jnp.float32)
        b = 0.05 * jax.random.normal(k3, (1, hidden_dim), jnp.float32)
        raw["convs"].append((wl, wr, b))
        wl_p = jnp.zeros((in_pad, hp), jnp.float32).at[:in_dim, :hidden_dim].set(wl)
        wr_p = jnp.zeros((in_pad, hp), jnp.float32).at[:in_dim, :hidden_dim].set(wr)
        b_p = jnp.zeros((1, hp), jnp.float32).at[:, :hidden_dim].set(b)
        packed["convs"].append((wl_p.astype(jnp.bfloat16),
                                wr_p.astype(jnp.bfloat16), b_p))
        in_dim, in_pad = hdim, hp_in

    key, k1, k2, k3, k4 = jax.random.split(key, 5)
    w1 = 0.1 * jax.random.normal(k1, (hdim, hidden_dim), jnp.float32)
    b1 = 0.05 * jax.random.normal(k3, (1, hidden_dim), jnp.float32)
    w2 = 0.1 * jax.random.normal(k2, (hidden_dim, output_dim), jnp.float32)
    b2 = 0.05 * jax.random.normal(k4, (1, output_dim), jnp.float32)
    raw["post_mp"] = (w1, b1, w2, b2)
    w1_p = jnp.zeros((hp_in, hp), jnp.float32).at[:hdim, :hidden_dim].set(w1)
    b1_p = jnp.zeros((1, hp), jnp.float32).at[:, :hidden_dim].set(b1)
    w2_p = jnp.zeros((hp, outp), jnp.float32).at[:hidden_dim, :output_dim].set(w2)
    b2_p = jnp.zeros((1, outp), jnp.float32).at[:, :output_dim].set(b2)
    packed["post_mp"] = (w1_p.astype(jnp.bfloat16), b1_p,
                         w2_p.astype(jnp.bfloat16), b2_p)
    return packed, raw


def build_adjacency(edge_index, num_nodes, padded_nodes):
    """int8 0/1 dense mask (rows=dst, cols=src) + exact f32 1/in-degree row scale."""
    # TODO(synk): duplicate edges collapse (set, not scatter-add); real sparse graphs should
    # use a CSR / scalar-prefetch gather-aggregation kernel instead of a dense mask.
    src, dst = edge_index
    mask = jnp.zeros((padded_nodes, padded_nodes), jnp.float32).at[dst, src].set(1.0)
    deg = jnp.sum(mask, axis=1, keepdims=True)
    inv_deg = 1.0 / jnp.maximum(deg, 1.0)
    adj_norm_ref = mask[:num_nodes, :num_nodes] * inv_deg[:num_nodes]
    return mask.astype(jnp.int8), inv_deg, adj_norm_ref


def reference_forward(x, adj_norm, raw):
    """Pure-JAX f32 reference of the same forward pass (sanity check)."""
    h = x
    for (wl, wr, b) in raw["convs"]:
        h = h @ wl + (adj_norm @ h) @ wr + b
        nrm = jnp.sqrt(jnp.sum(h * h, axis=-1, keepdims=True))
        h = h / jnp.maximum(nrm, 1e-12)
        h = jnp.maximum(h, 0.0)
    w1, b1, w2, b2 = raw["post_mp"]
    logits = (h @ w1 + b1) @ w2 + b2
    return jax.nn.log_softmax(logits, axis=1)


# ----------------------------------- main ----------------------------------- #

if __name__ == "__main__":
    # Small synthetic graph: 8 nodes, input_dim=16, hidden_dim=32, output_dim=8,
    # num_layers=2, heads=1 (GraphSage path), eval mode (dropout inactive).
    num_nodes, input_dim, hidden_dim, output_dim = 8, 16, 32, 8
    num_layers, heads = 2, 1

    key = jax.random.PRNGKey(0)
    key, kx = jax.random.split(key)
    x = jax.random.normal(kx, (num_nodes, input_dim), jnp.float32)

    # deterministic bidirectional ring + a couple of chords (PyG edge_index layout)
    src = jnp.array([0, 1, 2, 3, 4, 5, 6, 7, 1, 2, 3, 4, 5, 6, 7, 0, 0, 4, 2, 6],
                    dtype=jnp.int32)
    dst = jnp.array([1, 2, 3, 4, 5, 6, 7, 0, 0, 1, 2, 3, 4, 5, 6, 7, 4, 0, 6, 2],
                    dtype=jnp.int32)
    edge_index = jnp.stack([src, dst])  # (2, E)

    padded_nodes = _round_up(num_nodes, math.lcm(TM_NODES, TK_NODES))
    adj_i8, inv_deg, adj_norm = build_adjacency(edge_index, num_nodes, padded_nodes)
    params, raw = init_params(key, input_dim, hidden_dim, output_dim,
                              num_layers, heads)

    # TODO(synk): GAT branch of build_conv_model (attention coefficients) not implemented;
    # this realizes the GraphSage path of GNNStack.
    out = gnnstack_forward(x, adj_i8, inv_deg, params, output_dim)
    out = jax.block_until_ready(out)

    assert out.shape == (num_nodes, output_dim)
    assert bool(jnp.all(jnp.isfinite(out)))
    # rows of log_softmax must exponentiate-sum to 1
    assert bool(jnp.allclose(jnp.sum(jnp.exp(out), axis=1), 1.0, atol=1e-4))
    # match the pure-JAX f32 reference (bf16 MXU inputs -> loose tolerance)
    ref = reference_forward(x, adj_norm, raw)
    assert bool(jnp.allclose(out, ref, atol=7.5e-2, rtol=7.5e-2))
    print("KERNEL_OK")
</pallas_src>

<mosaic_0001>
module attributes {stable_mosaic.version = 11 : i64} {
  func.func @_proj_kernel(%arg0: i32, %arg1: memref<512x128xbf16, #tpu.memory_space<vmem>>, %arg2: memref<128x128xbf16, #tpu.memory_space<vmem>>, %arg3: memref<128x128xbf16, #tpu.memory_space<vmem>>, %arg4: memref<1x128xf32, #tpu.memory_space<vmem>>, %arg5: memref<512x128xf32, #tpu.memory_space<vmem>>, %arg6: memref<512x128xbf16, #tpu.memory_space<vmem>>) attributes {dimension_semantics = [#tpu.dimension_semantics<parallel>], iteration_bounds = array<i64: 1>, scalar_prefetch = 0 : i64, scratch_operands = 0 : i64, tpu.core_type = #tpu.core_type<tc>, window_params = [{transform_indices = @transform_0, window_bounds = array<i64: 512, 128>}, {pipeline_mode = #tpu.pipeline_mode<synchronous>, transform_indices = @transform_1, window_bounds = array<i64: 128, 128>}, {pipeline_mode = #tpu.pipeline_mode<synchronous>, transform_indices = @transform_2, window_bounds = array<i64: 128, 128>}, {pipeline_mode = #tpu.pipeline_mode<synchronous>, transform_indices = @transform_3, window_bounds = array<i64: 1, 128>}, {transform_indices = @transform_4, window_bounds = array<i64: 512, 128>}, {transform_indices = @transform_5, window_bounds = array<i64: 512, 128>}]} {
    %c0 = arith.constant 0 : index
    %c0_0 = arith.constant 0 : index
    %0 = vector.load %arg1[%c0, %c0_0] : memref<512x128xbf16, #tpu.memory_space<vmem>>, vector<512x128xbf16>
    %c0_1 = arith.constant 0 : index
    %c0_2 = arith.constant 0 : index
    %1 = vector.load %arg2[%c0_1, %c0_2] : memref<128x128xbf16, #tpu.memory_space<vmem>>, vector<128x128xbf16>
    %cst = arith.constant dense<0.000000e+00> : vector<512x128xf32>
    %2 = tpu.matmul %0, %1, %cst {dimension_numbers = #tpu.dot_dimension_numbers<[1], [0], [0], [1], [0, 0, 1, 1], [], []>} : vector<512x128xbf16>, vector<128x128xbf16>, vector<512x128xf32> -> vector<512x128xf32>
    %c0_3 = arith.constant 0 : index
    %c0_4 = arith.constant 0 : index
    %3 = vector.load %arg4[%c0_3, %c0_4] : memref<1x128xf32, #tpu.memory_space<vmem>>, vector<1x128xf32>
    %4 = vector.broadcast %3 : vector<1x128xf32> to vector<512x128xf32>
    %5 = arith.addf %2, %4 : vector<512x128xf32>
    %c0_5 = arith.constant 0 : index
    %c0_6 = arith.constant 0 : index
    %6 = vector.load %arg3[%c0_5, %c0_6] : memref<128x128xbf16, #tpu.memory_space<vmem>>, vector<128x128xbf16>
    %cst_7 = arith.constant dense<0.000000e+00> : vector<512x128xf32>
    %7 = tpu.matmul %0, %6, %cst_7 {dimension_numbers = #tpu.dot_dimension_numbers<[1], [0], [0], [1], [0, 0, 1, 1], [], []>} : vector<512x128xbf16>, vector<128x128xbf16>, vector<512x128xf32> -> vector<512x128xf32>
    %c0_8 = arith.constant 0 : index
    %c0_9 = arith.constant 0 : index
    %8 = vector.load %arg5[%c0_8, %c0_9] : memref<512x128xf32, #tpu.memory_space<vmem>>, vector<512x128xf32>
    tpu.vector_store %arg5[%c0_8, %c0_9], %5 {strides = array<i32>} : memref<512x128xf32, #tpu.memory_space<vmem>>, vector<512x128xf32>,
    %9 = arith.truncf %7 : vector<512x128xf32> to vector<512x128xbf16>
    %c0_10 = arith.constant 0 : index
    %c0_11 = arith.constant 0 : index
    %10 = vector.load %arg6[%c0_10, %c0_11] : memref<512x128xbf16, #tpu.memory_space<vmem>>, vector<512x128xbf16>
    tpu.vector_store %arg6[%c0_10, %c0_11], %9 {strides = array<i32>} : memref<512x128xbf16, #tpu.memory_space<vmem>>, vector<512x128xbf16>,
    return
  }
  func.func @transform_0(%arg0: i32) -> (i32, i32) {
    %c0_i32 = arith.constant 0 : i32
    %c0_i32_0 = arith.constant 0 : i32
    return %arg0, %c0_i32 : i32, i32
  }
  func.func @transform_1(%arg0: i32) -> (i32, i32) {
    %c0_i32 = arith.constant 0 : i32
    %c0_i32_0 = arith.constant 0 : i32
    %c0_i32_1 = arith.constant 0 : i32
    return %c0_i32, %c0_i32_0 : i32, i32
  }
  func.func @transform_2(%arg0: i32) -> (i32, i32) {
    %c0_i32 = arith.constant 0 : i32
    %c0_i32_0 = arith.constant 0 : i32
    %c0_i32_1 = arith.constant 0 : i32
    return %c0_i32, %c0_i32_0 : i32, i32
  }
  func.func @transform_3(%arg0: i32) -> (i32, i32) {
    %c0_i32 = arith.constant 0 : i32
    %c0_i32_0 = arith.constant 0 : i32
    %c0_i32_1 = arith.constant 0 : i32
    return %c0_i32, %c0_i32_0 : i32, i32
  }
  func.func @transform_4(%arg0: i32) -> (i32, i32) {
    %c0_i32 = arith.constant 0 : i32
    %c0_i32_0 = arith.constant 0 : i32
    return %arg0, %c0_i32 : i32, i32
  }
  func.func @transform_5(%arg0: i32) -> (i32, i32) {
    %c0_i32 = arith.constant 0 : i32
    %c0_i32_0 = arith.constant 0 : i32
    return %arg0, %c0_i32 : i32, i32
  }
}

</mosaic_0001>

<bundles_post_ra>
// kernel: tpu_custom_call.1
= control target key start
LH: loop header
LB: loop body
LE: loop exit
PB: predicated region body
PF: predicated region fallthrough
CT: control target
= control target key end

     0   :  { %11 = vsyncpa [#allocation3], 0  ;;  %s2427_s0 = inlined_call_operand.hbm [shape: bf16[512,128], index: 0, kind: input, shape index: {}]   ;;  %s2428_s1 = inlined_call_operand.hbm [shape: bf16[128,128], index: 1, kind: input, shape index: {}]   ;;  %s2429_s2 = inlined_call_operand.hbm [shape: bf16[128,128], index: 2, kind: input, shape index: {}]   ;;  %s2430_s3 = inlined_call_operand.vmem [shape: f32[1,128], index: 3, kind: input, shape index: {}]   ;;  %s2431_s4 = inlined_call_operand.hbm [shape: f32[512,128], index: 4, kind: output, shape index: {0}]   ;;  %s2432_s5 = inlined_call_operand.hbm [shape: bf16[512,128], index: 5, kind: output, shape index: {1}]  }
   0x1   :  { %12 = vsyncpa [#allocation6], 0 }
   0x2   :  { %13 = vsyncpa [#allocation4], 0 }
   0x3   :  { %14 = vsyncpa [#allocation10], 0  ;;  %s2233_s18 = smov [#allocation5]   ;;  %s2234_s20 = smov [#allocation2]  }
   0x4   :  { %s32_s19 = sshll.u32 %s2233_s18, 4  ;;  %s20_s21 = sshll.u32 %s2234_s20, 4  ;;  %s33_s19 = int_to_ptr.vmem [resolvable:$true] %s32_s19  ;;  %s2272_s21 = int_to_ptr.vmem [resolvable:$true] %s20_s21 }
   0x5   :  { %s2115_s24 = scalar_lea.hbm %s2428_s1, 1024 }
   0x6   :  { %p2116_p0 = scmp.ne.s32.totalorder %s2428_s1, %s2115_s24  ;;  %p2119_p1 = scmp.lt.u32.totalorder %s2115_s24, %s2428_s1 }
   0x8   :  { %p2121_p2 = pnand %p2119_p1, %p2116_p0 }
   0xa   :  { %2124 = shalt.err (!%p2121_p2)
}
   0xb   :  { %s2125_s29 = scalar_lea.vmem %s33_s19, 1024  ;;  %p2130_p4 = scmp.lt.s32.totalorder %s33_s19, %s33_s19 }
   0xc   :  { %p2126_p3 = scmp.ne.s32.totalorder %s33_s19, %s2125_s29  ;;  %p2131_p5 = scmp.lt.s32.totalorder %s2125_s29, %s2125_s29 }
   0xe   :  { %p2132_p6 = por %p2131_p5, %p2130_p4 }
  0x10   :  { %p2133_p7 = pnand %p2132_p6, %p2126_p3 }
  0x12   :  { %2136 = shalt.err (!%p2133_p7)
}
  0x13   :  { %s2235_s30 = smov 64   ;;  %s2236_s6 = smov 4  }
  0x14   :  { %38 = dma.hbm_to_vmem [thread:$0]  %s2428_s1, 1024, %s33_s19, [#allocation6], %s2235_s30, %s2235_s30, %s2236_s6  }
  0x15   :  { %s2137_s11 = scalar_lea.hbm %s2427_s0, 4096 }
  0x16   :  { %p2138_p8 = scmp.ne.s32.totalorder %s2427_s0, %s2137_s11  ;;  %p2141_p9 = scmp.lt.u32.totalorder %s2137_s11, %s2427_s0 }
  0x18   :  { %p2143_p10 = pnand %p2141_p9, %p2138_p8 }
  0x1a   :  { %2146 = shalt.err (!%p2143_p10)
}
  0x1b   :  { %s2147_s16 = scalar_lea.vmem %s2272_s21, 4096  ;;  %p2152_p12 = scmp.lt.s32.totalorder %s2272_s21, %s2272_s21 }
  0x1c   :  { %p2148_p11 = scmp.ne.s32.totalorder %s2272_s21, %s2147_s16  ;;  %p2153_p13 = scmp.lt.s32.totalorder %s2147_s16, %s2147_s16 }
  0x1e   :  { %p2154_p0 = por %p2153_p13, %p2152_p12 }
  0x20   :  { %p2155_p1 = pnand %p2154_p0, %p2148_p11 }
  0x22   :  { %2158 = shalt.err (!%p2155_p1)
}
  0x23   :  { %26 = dma.hbm_to_vmem [thread:$0]  %s2427_s0, 4096, %s2272_s21, [#allocation3], %s2235_s30, %s2235_s30, %s2236_s6  }
  0x24   :  { %s2237_s18 = smov [#allocation7]   ;;  %s2159_s23 = scalar_lea.hbm %s2429_s2, 1024 }
  0x25   :  { %s44_s19 = sshll.u32 %s2237_s18, 4  ;;  %p2160_p2 = scmp.ne.s32.totalorder %s2429_s2, %s2159_s23  ;;  %s45_s19 = int_to_ptr.vmem [resolvable:$true] %s44_s19 }
  0x26   :  { %p2163_p3 = scmp.lt.u32.totalorder %s2159_s23, %s2429_s2 }
  0x28   :  { %p2165_p4 = pnand %p2163_p3, %p2160_p2 }
  0x2a   :  { %2168 = shalt.err (!%p2165_p4)
}
  0x2b   :  { %s2169_s28 = scalar_lea.vmem %s45_s19, 1024  ;;  %p2174_p6 = scmp.lt.s32.totalorder %s45_s19, %s45_s19 }
  0x2c   :  { %p2170_p5 = scmp.ne.s32.totalorder %s45_s19, %s2169_s28  ;;  %p2175_p7 = scmp.lt.s32.totalorder %s2169_s28, %s2169_s28 }
  0x2e   :  { %p2176_p8 = por %p2175_p7, %p2174_p6 }
  0x30   :  { %p2177_p9 = pnand %p2176_p8, %p2170_p5 }
  0x32   :  { %2180 = shalt.err (!%p2177_p9)
}
  0x33   :  { %50 = dma.hbm_to_vmem [thread:$0]  %s2429_s2, 1024, %s45_s19, [#allocation6], %s2235_s30, %s2235_s30, %s2236_s6  }
  0x34   :  { %2225 = dma.done.wait [#allocation3], 4096  }
  0x35   :  { %2226 = vsyncadd [#allocation3], 4294963200 }
  0x36   :  { %2227 = dma.done.wait [#allocation6], 2048  }
  0x37   :  { %2228 = vsyncadd [#allocation6], 4294965248  ;;  %v2067_v0 = vld [vmem:[#allocation5] sm:$0xff]   ;;  %v2069_v2 = vld [vmem:[#allocation5 + $0x8] sm:$0xff]   ;;  %s2239_s8 = smov [#allocation9]  }
  0x38   :  { %v2068_v1 = vld [vmem:[#allocation7] sm:$0xff]   ;;  %1898 = vmatprep.subr.bf16.mxu0 %v2067_v0  ;;  %v2070_v3 = vld [vmem:[#allocation7 + $0x8] sm:$0xff]   ;;  %v2071_v4 = vld [vmem:[#allocation5 + $0x10] sm:$0xff]   ;;  %s1433_s9 = sshll.u32 %s2239_s8, 4  ;;  %s2393_s9 = int_to_ptr.vmem [resolvable:$true] %s1433_s9 }
  0x39   :  { %1978 = vmatprep.subr.bf16.mxu1 %v2068_v1  ;;  %1899 = vmatpush3.bf16.msra.mxu0 %v2067_v0  ;;  %v2072_v5 = vld [vmem:[#allocation7 + $0x10] sm:$0xff]   ;;  %v2073_v6 = vld [vmem:[#allocation5 + $0x18] sm:$0xff]   ;;  %v2075_v8 = vld [vmem:[#allocation5 + $0x20] sm:$0xff]  }
  0x3a   :  { %1979 = vmatpush3.bf16.msra.mxu1 %v2068_v1  ;;  %1900 = vmatprep.subr.bf16.mxu0 %v2069_v2  ;;  %v2074_v7 = vld [vmem:[#allocation7 + $0x18] sm:$0xff]   ;;  %v2076_v9 = vld [vmem:[#allocation7 + $0x20] sm:$0xff]   ;;  %v2077_v10 = vld [vmem:[#allocation5 + $0x28] sm:$0xff]  }
  0x3b   :  { %1980 = vmatprep.subr.bf16.mxu1 %v2070_v3  ;;  %v2083_v11 = vld [vmem:[#allocation2] sm:$0xff]   ;;  %v2078_v12 = vld [vmem:[#allocation7 + $0x28] sm:$0xff]   ;;  %v2079_v13 = vld [vmem:[#allocation5 + $0x30] sm:$0xff]  }
  0x3c   :  { %1914 = vmatprep.mubr.bf16.mxu0 %v2083_v11  ;;  %1994 = vmatprep.mubr.bf16.mxu1 %v2083_v11  ;;  %v2080_v14 = vld [vmem:[#allocation7 + $0x30] sm:$0xff]   ;;  %v2081_v15 = vld [vmem:[#allocation5 + $0x38] sm:$0xff]   ;;  %v2084_v17 = vld [vmem:[#allocation2 + $0x8] sm:$0xff]  }
  0x3d   :  { %1901 = vmatpush3.bf16.msra.mxu0 %v2069_v2  ;;  %v2082_v16 = vld [vmem:[#allocation7 + $0x38] sm:$0xff]   ;;  %v2085_v18 = vld [vmem:[#allocation2 + $0x10] sm:$0xff]   ;;  %v2087_v20 = vld [vmem:[#allocation2 + $0x20] sm:$0xff]  }
  0x3e   :  { %1981 = vmatpush3.bf16.msra.mxu1 %v2070_v3  ;;  %1902 = vmatprep.subr.bf16.mxu0 %v2071_v4  ;;  %v2086_v19 = vld [vmem:[#allocation2 + $0x18] sm:$0xff]   ;;  %v2088_v21 = vld [vmem:[#allocation2 + $0x28] sm:$0xff]   ;;  %v2089_v22 = vld [vmem:[#allocation2 + $0x30] sm:$0xff]  }
  0x3f   :  { %1982 = vmatprep.subr.bf16.mxu1 %v2072_v5  ;;  %v2090_v23 = vld [vmem:[#allocation2 + $0x38] sm:$0xff]   ;;  %v2091_v24 = vld [vmem:[#allocation2 + $0x40] sm:$0xff]   ;;  %v2092_v25 = vld [vmem:[#allocation2 + $0x48] sm:$0xff]  }
  0x40   :  { %v2093_v26 = vld [vmem:[#allocation2 + $0x50] sm:$0xff]   ;;  %v2094_v27 = vld [vmem:[#allocation2 + $0x58] sm:$0xff]   ;;  %v2095_v28 = vld [vmem:[#allocation2 + $0x60] sm:$0xff]  }
  0x41   :  { %1903 = vmatpush3.bf16.msra.mxu0 %v2071_v4  ;;  %v2096_v29 = vld [vmem:[#allocation2 + $0x68] sm:$0xff]   ;;  %v2097_v30 = vld [vmem:[#allocation2 + $0x70] sm:$0xff]   ;;  %v2098_v31 = vld [vmem:[#allocation2 + $0x78] sm:$0xff]  }
  0x42   :  { %1983 = vmatpush3.bf16.msra.mxu1 %v2072_v5  ;;  %1904 = vmatprep.subr.bf16.mxu0 %v2073_v6  ;;  %v2099_v32 = vld [vmem:[#allocation2 + $0x80] sm:$0xff]   ;;  %v2100_v33 = vld [vmem:[#allocation2 + $0x88] sm:$0xff]   ;;  %v2101_v34 = vld [vmem:[#allocation2 + $0x90] sm:$0xff]  }
  0x43   :  { %1984 = vmatprep.subr.bf16.mxu1 %v2074_v7  ;;  %v2102_v35 = vld [vmem:[#allocation2 + $0x98] sm:$0xff]   ;;  %v2103_v36 = vld [vmem:[#allocation2 + $0xa0] sm:$0xff]   ;;  %v2104_v37 = vld [vmem:[#allocation2 + $0xa8] sm:$0xff]  }
  0x44   :  { %v2105_v38 = vld [vmem:[#allocation2 + $0xb0] sm:$0xff]   ;;  %v2106_v39 = vld [vmem:[#allocation2 + $0xb8] sm:$0xff]   ;;  %v2107_v40 = vld [vmem:[#allocation2 + $0xc0] sm:$0xff]  }
  0x45   :  { %1905 = vmatpush3.bf16.msra.mxu0 %v2073_v6  ;;  %v2108_v41 = vld [vmem:[#allocation2 + $0xc8] sm:$0xff]   ;;  %v2109_v42 = vld [vmem:[#allocation2 + $0xd0] sm:$0xff]   ;;  %v2110_v43 = vld [vmem:[#allocation2 + $0xd8] sm:$0xff]  }
  0x46   :  { %1985 = vmatpush3.bf16.msra.mxu1 %v2074_v7  ;;  %1906 = vmatprep.subr.bf16.mxu0 %v2075_v8  ;;  %v2111_v44 = vld [vmem:[#allocation2 + $0xe0] sm:$0xff]   ;;  %v2112_v45 = vld [vmem:[#allocation2 + $0xe8] sm:$0xff]   ;;  %v2113_v46 = vld [vmem:[#allocation2 + $0xf0] sm:$0xff]  }
  0x47   :  { %1986 = vmatprep.subr.bf16.mxu1 %v2076_v9  ;;  %v2114_v47 = vld [vmem:[#allocation2 + $0xf8] sm:$0xff]   ;;  %v2327_v48 = vld [vmem:[%s2430_s3] ss:$0 sm:$0xff]  ;;  %s2238_s3 = smov [#allocation8]  }
  0x48   :  { %s1421_s7 = sshll.u32 %s2238_s3, 4  ;;  %s1422_s7 = int_to_ptr.vmem [resolvable:$true] %s1421_s7 }
  0x49   :  { %1907 = vmatpush3.bf16.msra.mxu0 %v2075_v8  ;;  %s2181_s10 = scalar_lea.vmem %s1422_s7, 8192  ;;  %p2186_p11 = scmp.lt.s32.totalorder %s1422_s7, %s1422_s7 }
  0x4a   :  { %1987 = vmatpush3.bf16.msra.mxu1 %v2076_v9  ;;  %1908 = vmatprep.subr.bf16.mxu0 %v2077_v10  ;;  %p2182_p10 = scmp.ne.s32.totalorder %s1422_s7, %s2181_s10  ;;  %p2187_p12 = scmp.lt.s32.totalorder %s2181_s10, %s2181_s10 }
  0x4b   :  { %1988 = vmatprep.subr.bf16.mxu1 %v2078_v12 }
  0x4c   :  { %p2188_p13 = por %p2187_p12, %p2186_p11 }
  0x4d   :  { %1909 = vmatpush3.bf16.msra.mxu0 %v2077_v10 }
  0x4e   :  { %1989 = vmatpush3.bf16.msra.mxu1 %v2078_v12  ;;  %1910 = vmatprep.subr.bf16.mxu0 %v2079_v13  ;;  %p2189_p0 = pnand %p2188_p13, %p2182_p10 }
  0x4f   :  { %1990 = vmatprep.subr.bf16.mxu1 %v2080_v14 }
  0x51   :  { %1911 = vmatpush3.bf16.msra.mxu0 %v2079_v13 }
  0x52   :  { %1991 = vmatpush3.bf16.msra.mxu1 %v2080_v14  ;;  %1912 = vmatprep.subr.bf16.mxu0 %v2081_v15 }
  0x53   :  { %1992 = vmatprep.subr.bf16.mxu1 %v2082_v16 }
  0x55   :  { %1913 = vmatpush3.bf16.msra.mxu0 %v2081_v15 }
  0x56   :  { %1993 = vmatpush3.bf16.msra.mxu1 %v2082_v16 }
  0x58   :  { %1915 = vmatmul.mubr.bf16.vlgmr.msra.gmra.mrb[0].mxu0 %v2084_v17 }
  0x59   :  { %1995 = vmatmul.mubr.bf16.vlgmr.msra.gmra.mrb[0].mxu1 %v2084_v17  ;;  %1918 = vmatprep.mubr.bf16.mxu0 %v2085_v18 }
  0x5a   :  { %1998 = vmatprep.mubr.bf16.mxu1 %v2085_v18 }
  0x60   :  { %1919 = vmatmul.mubr.bf16.gmra.mrb[4].mxu0 %v2086_v19 }
  0x61   :  { %1999 = vmatmul.mubr.bf16.gmra.mrb[4].mxu1 %v2086_v19  ;;  %1922 = vmatprep.mubr.bf16.mxu0 %v2087_v20 }
  0x62   :  { %2002 = vmatprep.mubr.bf16.mxu1 %v2087_v20 }
  0x68   :  { %1923 = vmatmul.mubr.bf16.gmra.mrb[8].mxu0 %v2088_v21 }
  0x69   :  { %2003 = vmatmul.mubr.bf16.gmra.mrb[8].mxu1 %v2088_v21  ;;  %1926 = vmatprep.mubr.bf16.mxu0 %v2089_v22 }
  0x6a   :  { %2006 = vmatprep.mubr.bf16.mxu1 %v2089_v22 }
  0x70   :  { %1927 = vmatmul.mubr.bf16.gmra.mrb[12].mxu0 %v2090_v23 }
  0x71   :  { %2007 = vmatmul.mubr.bf16.gmra.mrb[12].mxu1 %v2090_v23  ;;  %1930 = vmatprep.mubr.bf16.mxu0 %v2091_v24 }
  0x72   :  { %2010 = vmatprep.mubr.bf16.mxu1 %v2091_v24 }
  0x78   :  { %1931 = vmatmul.mubr.bf16.gmra.mrb[16].mxu0 %v2092_v25 }
  0x79   :  { %2011 = vmatmul.mubr.bf16.gmra.mrb[16].mxu1 %v2092_v25  ;;  %1934 = vmatprep.mubr.bf16.mxu0 %v2093_v26 }
  0x7a   :  { %2014 = vmatprep.mubr.bf16.mxu1 %v2093_v26 }
  0x80   :  { %1935 = vmatmul.mubr.bf16.gmra.mrb[20].mxu0 %v2094_v27 }
  0x81   :  { %2015 = vmatmul.mubr.bf16.gmra.mrb[20].mxu1 %v2094_v27  ;;  %1938 = vmatprep.mubr.bf16.mxu0 %v2095_v28 }
  0x82   :  { %2018 = vmatprep.mubr.bf16.mxu1 %v2095_v28 }
  0x88   :  { %1939 = vmatmul.mubr.bf16.gmra.mrb[24].mxu0 %v2096_v29 }
  0x89   :  { %2019 = vmatmul.mubr.bf16.gmra.mrb[24].mxu1 %v2096_v29  ;;  %1942 = vmatprep.mubr.bf16.mxu0 %v2097_v30 }
  0x8a   :  { %2022 = vmatprep.mubr.bf16.mxu1 %v2097_v30 }
  0x90   :  { %1943 = vmatmul.mubr.bf16.gmra.mrb[28].mxu0 %v2098_v31 }
  0x91   :  { %2023 = vmatmul.mubr.bf16.gmra.mrb[28].mxu1 %v2098_v31  ;;  %1946 = vmatprep.mubr.bf16.mxu0 %v2099_v32 }
  0x92   :  { %2026 = vmatprep.mubr.bf16.mxu1 %v2099_v32 }
  0x98   :  { %1947 = vmatmul.mubr.bf16.gmra.mrb[32].mxu0 %v2100_v33 }
  0x99   :  { %2027 = vmatmul.mubr.bf16.gmra.mrb[32].mxu1 %v2100_v33  ;;  %1950 = vmatprep.mubr.bf16.mxu0 %v2101_v34 }
  0x9a   :  { %2030 = vmatprep.mubr.bf16.mxu1 %v2101_v34 }
  0xa0   :  { %1951 = vmatmul.mubr.bf16.gmra.mrb[36].mxu0 %v2102_v35 }
  0xa1   :  { %2031 = vmatmul.mubr.bf16.gmra.mrb[36].mxu1 %v2102_v35  ;;  %1954 = vmatprep.mubr.bf16.mxu0 %v2103_v36 }
  0xa2   :  { %2034 = vmatprep.mubr.bf16.mxu1 %v2103_v36 }
  0xa8   :  { %1955 = vmatmul.mubr.bf16.gmra.mrb[40].mxu0 %v2104_v37 }
  0xa9   :  { %2035 = vmatmul.mubr.bf16.gmra.mrb[40].mxu1 %v2104_v37  ;;  %1958 = vmatprep.mubr.bf16.mxu0 %v2105_v38 }
  0xaa   :  { %2038 = vmatprep.mubr.bf16.mxu1 %v2105_v38 }
  0xb0   :  { %1959 = vmatmul.mubr.bf16.gmra.mrb[44].mxu0 %v2106_v39 }
  0xb1   :  { %2039 = vmatmul.mubr.bf16.gmra.mrb[44].mxu1 %v2106_v39  ;;  %1962 = vmatprep.mubr.bf16.mxu0 %v2107_v40 }
  0xb2   :  { %2042 = vmatprep.mubr.bf16.mxu1 %v2107_v40 }
  0xb8   :  { %1963 = vmatmul.mubr.bf16.gmra.mrb[48].mxu0 %v2108_v41 }
  0xb9   :  { %2043 = vmatmul.mubr.bf16.gmra.mrb[48].mxu1 %v2108_v41  ;;  %1966 = vmatprep.mubr.bf16.mxu0 %v2109_v42 }
  0xba   :  { %2046 = vmatprep.mubr.bf16.mxu1 %v2109_v42 }
  0xc0   :  { %1967 = vmatmul.mubr.bf16.gmra.mrb[52].mxu0 %v2110_v43 }
  0xc1   :  { %2047 = vmatmul.mubr.bf16.gmra.mrb[52].mxu1 %v2110_v43  ;;  %1970 = vmatprep.mubr.bf16.mxu0 %v2111_v44 }
  0xc2   :  { %2050 = vmatprep.mubr.bf16.mxu1 %v2111_v44 }
  0xc8   :  { %1971 = vmatmul.mubr.bf16.gmra.mrb[56].mxu0 %v2112_v45 }
  0xc9   :  { %2051 = vmatmul.mubr.bf16.gmra.mrb[56].mxu1 %v2112_v45  ;;  %1974 = vmatprep.mubr.bf16.mxu0 %v2113_v46 }
  0xca   :  { %2054 = vmatprep.mubr.bf16.mxu1 %v2113_v46 }
  0xd0   :  { %1975 = vmatmul.mubr.bf16.gmra.mrb[60].mxu0 %v2114_v47 }
  0xd1   :  { %2055 = vmatmul.mubr.bf16.gmra.mrb[60].mxu1 %v2114_v47 }
 0x12b   :  { %v1916_v49 = vpop.f32.mrb[0].mxu0 }
 0x12c   :  { %v433_v50 = vadd.f32 %v1916_v49, %v2327_v48  ;;  %v1996_v51 = vpop.f32.mrb[0].mxu1  ;;  %v424_v52 = vpop.f32.mrb[1].mxu0 }
 0x12d   :  { %v425_v53 = vadd.f32 %v2327_v48, %v424_v52  ;;  %v777_v54 = vpop.f32.mrb[1].mxu1  ;;  %v1917_v55 = vpop.f32.mrb[2].mxu0 }
 0x12e   :  { %1034 = vst [vmem:[#allocation8 + $0x10] sm:$0xff] %v433_v50  ;;  %v436_v56 = vadd.f32 %v1917_v55, %v2327_v48  ;;  %v1997_v57 = vpop.f32.mrb[2].mxu1  ;;  %v427_v58 = vpop.f32.mrb[3].mxu0 }
 0x12f   :  { %1032 = vst [vmem:[#allocation8] sm:$0xff] %v425_v53  ;;  %v1635_v59 = vpack.c.bf16 %v1997_v57, %v1996_v51  ;;  %v428_v60 = vadd.f32 %v2327_v48, %v427_v58  ;;  %v780_v61 = vpop.f32.mrb[3].mxu1 }
 0x130   :  { %1035 = vst [vmem:[#allocation8 + $0x18] sm:$0xff] %v436_v56  ;;  %v1630_v62 = vpack.c.bf16 %v780_v61, %v777_v54 }
 0x131   :  { %1787 = vst [vmem:[#allocation9 + $0x8] sm:$0xff] %v1635_v59   ;;  %1033 = vst [vmem:[#allocation8 + $0x8] sm:$0xff] %v428_v60 }
 0x132   :  { %1631 = vst [vmem:[#allocation9] sm:$0xff] %v1630_v62  }
 0x133   :  { %v1920_v63 = vpop.f32.mrb[4].mxu0 }
 0x134   :  { %v449_v0 = vadd.f32 %v1920_v63, %v2327_v48  ;;  %v2000_v1 = vpop.f32.mrb[4].mxu1  ;;  %v440_v2 = vpop.f32.mrb[5].mxu0 }
 0x135   :  { %v441_v3 = vadd.f32 %v2327_v48, %v440_v2  ;;  %v793_v4 = vpop.f32.mrb[5].mxu1  ;;  %v1921_v5 = vpop.f32.mrb[6].mxu0 }
 0x136   :  { %1038 = vst [vmem:[#allocation8 + $0x30] sm:$0xff] %v449_v0  ;;  %v452_v6 = vadd.f32 %v1921_v5, %v2327_v48  ;;  %v2001_v7 = vpop.f32.mrb[6].mxu1  ;;  %v443_v8 = vpop.f32.mrb[7].mxu0 }
 0x137   :  { %1036 = vst [vmem:[#allocation8 + $0x20] sm:$0xff] %v441_v3  ;;  %v1645_v9 = vpack.c.bf16 %v2001_v7, %v2000_v1  ;;  %v444_v10 = vadd.f32 %v2327_v48, %v443_v8  ;;  %v796_v11 = vpop.f32.mrb[7].mxu1 }
 0x138   :  { %1039 = vst [vmem:[#allocation8 + $0x38] sm:$0xff] %v452_v6  ;;  %v1640_v12 = vpack.c.bf16 %v796_v11, %v793_v4 }
 0x139   :  { %1789 = vst [vmem:[#allocation9 + $0x18] sm:$0xff] %v1645_v9   ;;  %1037 = vst [vmem:[#allocation8 + $0x28] sm:$0xff] %v444_v10 }
 0x13a   :  { %1788 = vst [vmem:[#allocation9 + $0x10] sm:$0xff] %v1640_v12  }
 0x13b   :  { %v1924_v13 = vpop.f32.mrb[8].mxu0 }
 0x13c   :  { %v465_v14 = vadd.f32 %v1924_v13, %v2327_v48  ;;  %v2004_v15 = vpop.f32.mrb[8].mxu1  ;;  %v456_v16 = vpop.f32.mrb[9].mxu0 }
 0x13d   :  { %v457_v17 = vadd.f32 %v2327_v48, %v456_v16  ;;  %v809_v18 = vpop.f32.mrb[9].mxu1  ;;  %v1925_v19 = vpop.f32.mrb[10].mxu0 }
 0x13e   :  { %1042 = vst [vmem:[#allocation8 + $0x50] sm:$0xff] %v465_v14  ;;  %v468_v20 = vadd.f32 %v1925_v19, %v2327_v48  ;;  %v2005_v21 = vpop.f32.mrb[10].mxu1  ;;  %v459_v22 = vpop.f32.mrb[11].mxu0 }
 0x13f   :  { %1040 = vst [vmem:[#allocation8 + $0x40] sm:$0xff] %v457_v17  ;;  %v1655_v23 = vpack.c.bf16 %v2005_v21, %v2004_v15  ;;  %v460_v24 = vadd.f32 %v2327_v48, %v459_v22  ;;  %v812_v25 = vpop.f32.mrb[11].mxu1 }
 0x140   :  { %1043 = vst [vmem:[#allocation8 + $0x58] sm:$0xff] %v468_v20  ;;  %v1650_v26 = vpack.c.bf16 %v812_v25, %v809_v18 }
 0x141   :  { %1791 = vst [vmem:[#allocation9 + $0x28] sm:$0xff] %v1655_v23   ;;  %1041 = vst [vmem:[#allocation8 + $0x48] sm:$0xff] %v460_v24 }
 0x142   :  { %1790 = vst [vmem:[#allocation9 + $0x20] sm:$0xff] %v1650_v26  }
 0x143   :  { %v1928_v27 = vpop.f32.mrb[12].mxu0 }
 0x144   :  { %v481_v28 = vadd.f32 %v1928_v27, %v2327_v48  ;;  %v2008_v29 = vpop.f32.mrb[12].mxu1  ;;  %v472_v30 = vpop.f32.mrb[13].mxu0 }
 0x145   :  { %v473_v31 = vadd.f32 %v2327_v48, %v472_v30  ;;  %v825_v32 = vpop.f32.mrb[13].mxu1  ;;  %v1929_v33 = vpop.f32.mrb[14].mxu0 }
 0x146   :  { %1046 = vst [vmem:[#allocation8 + $0x70] sm:$0xff] %v481_v28  ;;  %v484_v34 = vadd.f32 %v1929_v33, %v2327_v48  ;;  %v2009_v35 = vpop.f32.mrb[14].mxu1  ;;  %v475_v36 = vpop.f32.mrb[15].mxu0 }
 0x147   :  { %1044 = vst [vmem:[#allocation8 + $0x60] sm:$0xff] %v473_v31  ;;  %v1665_v37 = vpack.c.bf16 %v2009_v35, %v2008_v29  ;;  %v476_v38 = vadd.f32 %v2327_v48, %v475_v36  ;;  %v828_v39 = vpop.f32.mrb[15].mxu1 }
 0x148   :  { %1047 = vst [vmem:[#allocation8 + $0x78] sm:$0xff] %v484_v34  ;;  %v1660_v40 = vpack.c.bf16 %v828_v39, %v825_v32 }
 0x149   :  { %1793 = vst [vmem:[#allocation9 + $0x38] sm:$0xff] %v1665_v37   ;;  %1045 = vst [vmem:[#allocation8 + $0x68] sm:$0xff] %v476_v38 }
 0x14a   :  { %1792 = vst [vmem:[#allocation9 + $0x30] sm:$0xff] %v1660_v40  }
 0x14b   :  { %v1932_v41 = vpop.f32.mrb[16].mxu0 }
 0x14c   :  { %v497_v42 = vadd.f32 %v1932_v41, %v2327_v48  ;;  %v2012_v43 = vpop.f32.mrb[16].mxu1  ;;  %v488_v44 = vpop.f32.mrb[17].mxu0 }
 0x14d   :  { %v489_v45 = vadd.f32 %v2327_v48, %v488_v44  ;;  %v841_v46 = vpop.f32.mrb[17].mxu1  ;;  %v1933_v47 = vpop.f32.mrb[18].mxu0 }
 0x14e   :  { %1050 = vst [vmem:[#allocation8 + $0x90] sm:$0xff] %v497_v42  ;;  %v500_v49 = vadd.f32 %v1933_v47, %v2327_v48  ;;  %v2013_v50 = vpop.f32.mrb[18].mxu1  ;;  %v491_v51 = vpop.f32.mrb[19].mxu0 }
 0x14f   :  { %1048 = vst [vmem:[#allocation8 + $0x80] sm:$0xff] %v489_v45  ;;  %v1675_v52 = vpack.c.bf16 %v2013_v50, %v2012_v43  ;;  %v492_v53 = vadd.f32 %v2327_v48, %v491_v51  ;;  %v844_v54 = vpop.f32.mrb[19].mxu1 }
 0x150   :  { %1051 = vst [vmem:[#allocation8 + $0x98] sm:$0xff] %v500_v49  ;;  %v1670_v55 = vpack.c.bf16 %v844_v54, %v841_v46 }
 0x151   :  { %1795 = vst [vmem:[#allocation9 + $0x48] sm:$0xff] %v1675_v52   ;;  %1049 = vst [vmem:[#allocation8 + $0x88] sm:$0xff] %v492_v53 }
 0x152   :  { %1794 = vst [vmem:[#allocation9 + $0x40] sm:$0xff] %v1670_v55  }
 0x153   :  { %v1936_v56 = vpop.f32.mrb[20].mxu0 }
 0x154   :  { %v513_v57 = vadd.f32 %v1936_v56, %v2327_v48  ;;  %v2016_v58 = vpop.f32.mrb[20].mxu1  ;;  %v504_v59 = vpop.f32.mrb[21].mxu0 }
 0x155   :  { %v505_v60 = vadd.f32 %v2327_v48, %v504_v59  ;;  %v857_v61 = vpop.f32.mrb[21].mxu1  ;;  %v1937_v62 = vpop.f32.mrb[22].mxu0 }
 0x156   :  { %1054 = vst [vmem:[#allocation8 + $0xb0] sm:$0xff] %v513_v57  ;;  %v516_v63 = vadd.f32 %v1937_v62, %v2327_v48  ;;  %v2017_v0 = vpop.f32.mrb[22].mxu1  ;;  %v507_v1 = vpop.f32.mrb[23].mxu0 }
 0x157   :  { %1052 = vst [vmem:[#allocation8 + $0xa0] sm:$0xff] %v505_v60  ;;  %v1685_v2 = vpack.c.bf16 %v2017_v0, %v2016_v58  ;;  %v508_v3 = vadd.f32 %v2327_v48, %v507_v1  ;;  %v860_v4 = vpop.f32.mrb[23].mxu1 }
 0x158   :  { %1055 = vst [vmem:[#allocation8 + $0xb8] sm:$0xff] %v516_v63  ;;  %v1680_v5 = vpack.c.bf16 %v860_v4, %v857_v61 }
 0x159   :  { %1797 = vst [vmem:[#allocation9 + $0x58] sm:$0xff] %v1685_v2   ;;  %1053 = vst [vmem:[#allocation8 + $0xa8] sm:$0xff] %v508_v3 }
 0x15a   :  { %1796 = vst [vmem:[#allocation9 + $0x50] sm:$0xff] %v1680_v5  }
 0x15b   :  { %v1940_v6 = vpop.f32.mrb[24].mxu0 }
 0x15c   :  { %v529_v7 = vadd.f32 %v1940_v6, %v2327_v48  ;;  %v2020_v8 = vpop.f32.mrb[24].mxu1  ;;  %v520_v9 = vpop.f32.mrb[25].mxu0 }
 0x15d   :  { %v521_v10 = vadd.f32 %v2327_v48, %v520_v9  ;;  %v873_v11 = vpop.f32.mrb[25].mxu1  ;;  %v1941_v12 = vpop.f32.mrb[26].mxu0 }
 0x15e   :  { %1058 = vst [vmem:[#allocation8 + $0xd0] sm:$0xff] %v529_v7  ;;  %v532_v13 = vadd.f32 %v1941_v12, %v2327_v48  ;;  %v2021_v14 = vpop.f32.mrb[26].mxu1  ;;  %v523_v15 = vpop.f32.mrb[27].mxu0 }
 0x15f   :  { %1056 = vst [vmem:[#allocation8 + $0xc0] sm:$0xff] %v521_v10  ;;  %v1695_v16 = vpack.c.bf16 %v2021_v14, %v2020_v8  ;;  %v524_v17 = vadd.f32 %v2327_v48, %v523_v15  ;;  %v876_v18 = vpop.f32.mrb[27].mxu1 }
 0x160   :  { %1059 = vst [vmem:[#allocation8 + $0xd8] sm:$0xff] %v532_v13  ;;  %v1690_v19 = vpack.c.bf16 %v876_v18, %v873_v11 }
 0x161   :  { %1799 = vst [vmem:[#allocation9 + $0x68] sm:$0xff] %v1695_v16   ;;  %1057 = vst [vmem:[#allocation8 + $0xc8] sm:$0xff] %v524_v17 }
 0x162   :  { %1798 = vst [vmem:[#allocation9 + $0x60] sm:$0xff] %v1690_v19  }
 0x163   :  { %v1944_v20 = vpop.f32.mrb[28].mxu0 }
 0x164   :  { %v545_v21 = vadd.f32 %v1944_v20, %v2327_v48  ;;  %v2024_v22 = vpop.f32.mrb[28].mxu1  ;;  %v536_v23 = vpop.f32.mrb[29].mxu0 }
 0x165   :  { %v537_v24 = vadd.f32 %v2327_v48, %v536_v23  ;;  %v889_v25 = vpop.f32.mrb[29].mxu1  ;;  %v1945_v26 = vpop.f32.mrb[30].mxu0 }
 0x166   :  { %1062 = vst [vmem:[#allocation8 + $0xf0] sm:$0xff] %v545_v21  ;;  %v548_v27 = vadd.f32 %v1945_v26, %v2327_v48  ;;  %v2025_v28 = vpop.f32.mrb[30].mxu1  ;;  %v539_v29 = vpop.f32.mrb[31].mxu0 }
 0x167   :  { %1060 = vst [vmem:[#allocation8 + $0xe0] sm:$0xff] %v537_v24  ;;  %v1705_v30 = vpack.c.bf16 %v2025_v28, %v2024_v22  ;;  %v540_v31 = vadd.f32 %v2327_v48, %v539_v29  ;;  %v892_v32 = vpop.f32.mrb[31].mxu1 }
 0x168   :  { %1063 = vst [vmem:[#allocation8 + $0xf8] sm:$0xff] %v548_v27  ;;  %v1700_v33 = vpack.c.bf16 %v892_v32, %v889_v25 }
 0x169   :  { %1801 = vst [vmem:[#allocation9 + $0x78] sm:$0xff] %v1705_v30   ;;  %1061 = vst [vmem:[#allocation8 + $0xe8] sm:$0xff] %v540_v31 }
 0x16a   :  { %1800 = vst [vmem:[#allocation9 + $0x70] sm:$0xff] %v1700_v33  }
 0x16b   :  { %v1948_v34 = vpop.f32.mrb[32].mxu0 }
 0x16c   :  { %v561_v35 = vadd.f32 %v1948_v34, %v2327_v48  ;;  %v2028_v36 = vpop.f32.mrb[32].mxu1  ;;  %v552_v37 = vpop.f32.mrb[33].mxu0 }
 0x16d   :  { %v553_v38 = vadd.f32 %v2327_v48, %v552_v37  ;;  %v905_v39 = vpop.f32.mrb[33].mxu1  ;;  %v1949_v40 = vpop.f32.mrb[34].mxu0 }
 0x16e   :  { %1066 = vst [vmem:[#allocation8 + $0x110] sm:$0xff] %v561_v35  ;;  %v564_v41 = vadd.f32 %v1949_v40, %v2327_v48  ;;  %v2029_v42 = vpop.f32.mrb[34].mxu1  ;;  %v555_v43 = vpop.f32.mrb[35].mxu0 }
 0x16f   :  { %1064 = vst [vmem:[#allocation8 + $0x100] sm:$0xff] %v553_v38  ;;  %v1715_v44 = vpack.c.bf16 %v2029_v42, %v2028_v36  ;;  %v556_v45 = vadd.f32 %v2327_v48, %v555_v43  ;;  %v908_v46 = vpop.f32.mrb[35].mxu1 }
 0x170   :  { %1067 = vst [vmem:[#allocation8 + $0x118] sm:$0xff] %v564_v41  ;;  %v1710_v47 = vpack.c.bf16 %v908_v46, %v905_v39 }
 0x171   :  { %1803 = vst [vmem:[#allocation9 + $0x88] sm:$0xff] %v1715_v44   ;;  %1065 = vst [vmem:[#allocation8 + $0x108] sm:$0xff] %v556_v45 }
 0x172   :  { %1802 = vst [vmem:[#allocation9 + $0x80] sm:$0xff] %v1710_v47  }
 0x173   :  { %v1952_v49 = vpop.f32.mrb[36].mxu0 }
 0x174   :  { %v577_v50 = vadd.f32 %v1952_v49, %v2327_v48  ;;  %v2032_v51 = vpop.f32.mrb[36].mxu1  ;;  %v568_v52 = vpop.f32.mrb[37].mxu0 }
 0x175   :  { %v569_v53 = vadd.f32 %v2327_v48, %v568_v52  ;;  %v921_v54 = vpop.f32.mrb[37].mxu1  ;;  %v1953_v55 = vpop.f32.mrb[38].mxu0 }
 0x176   :  { %1070 = vst [vmem:[#allocation8 + $0x130] sm:$0xff] %v577_v50  ;;  %v580_v56 = vadd.f32 %v1953_v55, %v2327_v48  ;;  %v2033_v57 = vpop.f32.mrb[38].mxu1  ;;  %v571_v58 = vpop.f32.mrb[39].mxu0 }
 0x177   :  { %1068 = vst [vmem:[#allocation8 + $0x120] sm:$0xff] %v569_v53  ;;  %v1725_v59 = vpack.c.bf16 %v2033_v57, %v2032_v51  ;;  %v572_v60 = vadd.f32 %v2327_v48, %v571_v58  ;;  %v924_v61 = vpop.f32.mrb[39].mxu1 }
 0x178   :  { %1071 = vst [vmem:[#allocation8 + $0x138] sm:$0xff] %v580_v56  ;;  %v1720_v62 = vpack.c.bf16 %v924_v61, %v921_v54 }
 0x179   :  { %1805 = vst [vmem:[#allocation9 + $0x98] sm:$0xff] %v1725_v59   ;;  %1069 = vst [vmem:[#allocation8 + $0x128] sm:$0xff] %v572_v60 }
 0x17a   :  { %1804 = vst [vmem:[#allocation9 + $0x90] sm:$0xff] %v1720_v62  }
 0x17b   :  { %v1956_v63 = vpop.f32.mrb[40].mxu0 }
 0x17c   :  { %v593_v0 = vadd.f32 %v1956_v63, %v2327_v48  ;;  %v2036_v1 = vpop.f32.mrb[40].mxu1  ;;  %v584_v2 = vpop.f32.mrb[41].mxu0 }
 0x17d   :  { %v585_v3 = vadd.f32 %v2327_v48, %v584_v2  ;;  %v937_v4 = vpop.f32.mrb[41].mxu1  ;;  %v1957_v5 = vpop.f32.mrb[42].mxu0 }
 0x17e   :  { %1074 = vst [vmem:[#allocation8 + $0x150] sm:$0xff] %v593_v0  ;;  %v596_v6 = vadd.f32 %v1957_v5, %v2327_v48  ;;  %v2037_v7 = vpop.f32.mrb[42].mxu1  ;;  %v587_v8 = vpop.f32.mrb[43].mxu0 }
 0x17f   :  { %1072 = vst [vmem:[#allocation8 + $0x140] sm:$0xff] %v585_v3  ;;  %v1735_v9 = vpack.c.bf16 %v2037_v7, %v2036_v1  ;;  %v588_v10 = vadd.f32 %v2327_v48, %v587_v8  ;;  %v940_v11 = vpop.f32.mrb[43].mxu1 }
 0x180   :  { %1075 = vst [vmem:[#allocation8 + $0x158] sm:$0xff] %v596_v6  ;;  %v1730_v12 = vpack.c.bf16 %v940_v11, %v937_v4 }
 0x181   :  { %1807 = vst [vmem:[#allocation9 + $0xa8] sm:$0xff] %v1735_v9   ;;  %1073 = vst [vmem:[#allocation8 + $0x148] sm:$0xff] %v588_v10 }
 0x182   :  { %1806 = vst [vmem:[#allocation9 + $0xa0] sm:$0xff] %v1730_v12  }
 0x183   :  { %v1960_v13 = vpop.f32.mrb[44].mxu0 }
 0x184   :  { %v609_v14 = vadd.f32 %v1960_v13, %v2327_v48  ;;  %v2040_v15 = vpop.f32.mrb[44].mxu1  ;;  %v600_v16 = vpop.f32.mrb[45].mxu0 }
 0x185   :  { %v601_v17 = vadd.f32 %v2327_v48, %v600_v16  ;;  %v953_v18 = vpop.f32.mrb[45].mxu1  ;;  %v1961_v19 = vpop.f32.mrb[46].mxu0 }
 0x186   :  { %1078 = vst [vmem:[#allocation8 + $0x170] sm:$0xff] %v609_v14  ;;  %v612_v20 = vadd.f32 %v1961_v19, %v2327_v48  ;;  %v2041_v21 = vpop.f32.mrb[46].mxu1  ;;  %v603_v22 = vpop.f32.mrb[47].mxu0 }
 0x187   :  { %1076 = vst [vmem:[#allocation8 + $0x160] sm:$0xff] %v601_v17  ;;  %v1745_v23 = vpack.c.bf16 %v2041_v21, %v2040_v15  ;;  %v604_v24 = vadd.f32 %v2327_v48, %v603_v22  ;;  %v956_v25 = vpop.f32.mrb[47].mxu1 }
 0x188   :  { %1079 = vst [vmem:[#allocation8 + $0x178] sm:$0xff] %v612_v20  ;;  %v1740_v26 = vpack.c.bf16 %v956_v25, %v953_v18 }
 0x189   :  { %1809 = vst [vmem:[#allocation9 + $0xb8] sm:$0xff] %v1745_v23   ;;  %1077 = vst [vmem:[#allocation8 + $0x168] sm:$0xff] %v604_v24 }
 0x18a   :  { %1808 = vst [vmem:[#allocation9 + $0xb0] sm:$0xff] %v1740_v26  }
 0x18b   :  { %v1964_v27 = vpop.f32.mrb[48].mxu0 }
 0x18c   :  { %v625_v28 = vadd.f32 %v1964_v27, %v2327_v48  ;;  %v2044_v29 = vpop.f32.mrb[48].mxu1  ;;  %v616_v30 = vpop.f32.mrb[49].mxu0 }
 0x18d   :  { %v617_v31 = vadd.f32 %v2327_v48, %v616_v30  ;;  %v969_v32 = vpop.f32.mrb[49].mxu1  ;;  %v1965_v33 = vpop.f32.mrb[50].mxu0 }
 0x18e   :  { %1082 = vst [vmem:[#allocation8 + $0x190] sm:$0xff] %v625_v28  ;;  %v628_v34 = vadd.f32 %v1965_v33, %v2327_v48  ;;  %v2045_v35 = vpop.f32.mrb[50].mxu1  ;;  %v619_v36 = vpop.f32.mrb[51].mxu0 }
 0x18f   :  { %1080 = vst [vmem:[#allocation8 + $0x180] sm:$0xff] %v617_v31  ;;  %v1755_v37 = vpack.c.bf16 %v2045_v35, %v2044_v29  ;;  %v620_v38 = vadd.f32 %v2327_v48, %v619_v36  ;;  %v972_v39 = vpop.f32.mrb[51].mxu1 }
 0x190   :  { %1083 = vst [vmem:[#allocation8 + $0x198] sm:$0xff] %v628_v34  ;;  %v1750_v40 = vpack.c.bf16 %v972_v39, %v969_v32 }
 0x191   :  { %1811 = vst [vmem:[#allocation9 + $0xc8] sm:$0xff] %v1755_v37   ;;  %1081 = vst [vmem:[#allocation8 + $0x188] sm:$0xff] %v620_v38 }
 0x192   :  { %1810 = vst [vmem:[#allocation9 + $0xc0] sm:$0xff] %v1750_v40  }
 0x193   :  { %v1968_v41 = vpop.f32.mrb[52].mxu0 }
 0x194   :  { %v641_v42 = vadd.f32 %v1968_v41, %v2327_v48  ;;  %v2048_v43 = vpop.f32.mrb[52].mxu1  ;;  %v632_v44 = vpop.f32.mrb[53].mxu0 }
 0x195   :  { %v633_v45 = vadd.f32 %v2327_v48, %v632_v44  ;;  %v985_v46 = vpop.f32.mrb[53].mxu1  ;;  %v1969_v47 = vpop.f32.mrb[54].mxu0 }
 0x196   :  { %1086 = vst [vmem:[#allocation8 + $0x1b0] sm:$0xff] %v641_v42  ;;  %v644_v49 = vadd.f32 %v1969_v47, %v2327_v48  ;;  %v2049_v50 = vpop.f32.mrb[54].mxu1  ;;  %v635_v51 = vpop.f32.mrb[55].mxu0 }
 0x197   :  { %1084 = vst [vmem:[#allocation8 + $0x1a0] sm:$0xff] %v633_v45  ;;  %v1765_v52 = vpack.c.bf16 %v2049_v50, %v2048_v43  ;;  %v636_v53 = vadd.f32 %v2327_v48, %v635_v51  ;;  %v988_v54 = vpop.f32.mrb[55].mxu1 }
 0x198   :  { %1087 = vst [vmem:[#allocation8 + $0x1b8] sm:$0xff] %v644_v49  ;;  %v1760_v55 = vpack.c.bf16 %v988_v54, %v985_v46 }
 0x199   :  { %1813 = vst [vmem:[#allocation9 + $0xd8] sm:$0xff] %v1765_v52   ;;  %1085 = vst [vmem:[#allocation8 + $0x1a8] sm:$0xff] %v636_v53 }
 0x19a   :  { %1812 = vst [vmem:[#allocation9 + $0xd0] sm:$0xff] %v1760_v55  }
 0x19b   :  { %v1972_v56 = vpop.f32.mrb[56].mxu0 }
 0x19c   :  { %v657_v57 = vadd.f32 %v1972_v56, %v2327_v48  ;;  %v2052_v58 = vpop.f32.mrb[56].mxu1  ;;  %v648_v59 = vpop.f32.mrb[57].mxu0 }
 0x19d   :  { %v649_v60 = vadd.f32 %v2327_v48, %v648_v59  ;;  %v1001_v61 = vpop.f32.mrb[57].mxu1  ;;  %v1973_v62 = vpop.f32.mrb[58].mxu0 }
 0x19e   :  { %1090 = vst [vmem:[#allocation8 + $0x1d0] sm:$0xff] %v657_v57  ;;  %v660_v63 = vadd.f32 %v1973_v62, %v2327_v48  ;;  %v2053_v0 = vpop.f32.mrb[58].mxu1  ;;  %v651_v1 = vpop.f32.mrb[59].mxu0 }
 0x19f   :  { %1088 = vst [vmem:[#allocation8 + $0x1c0] sm:$0xff] %v649_v60  ;;  %v1775_v2 = vpack.c.bf16 %v2053_v0, %v2052_v58  ;;  %v652_v3 = vadd.f32 %v2327_v48, %v651_v1  ;;  %v1004_v4 = vpop.f32.mrb[59].mxu1 }
 0x1a0   :  { %1091 = vst [vmem:[#allocation8 + $0x1d8] sm:$0xff] %v660_v63  ;;  %v1770_v5 = vpack.c.bf16 %v1004_v4, %v1001_v61 }
 0x1a1   :  { %1815 = vst [vmem:[#allocation9 + $0xe8] sm:$0xff] %v1775_v2   ;;  %1089 = vst [vmem:[#allocation8 + $0x1c8] sm:$0xff] %v652_v3 }
 0x1a2   :  { %1814 = vst [vmem:[#allocation9 + $0xe0] sm:$0xff] %v1770_v5  }
 0x1a3   :  { %v1976_v6 = vpop.f32.mrb[60].mxu0 }
 0x1a4   :  { %v673_v7 = vadd.f32 %v1976_v6, %v2327_v48  ;;  %v2056_v8 = vpop.f32.mrb[60].mxu1  ;;  %v664_v9 = vpop.f32.mrb[61].mxu0 }
 0x1a5   :  { %v665_v10 = vadd.f32 %v2327_v48, %v664_v9  ;;  %v1017_v11 = vpop.f32.mrb[61].mxu1  ;;  %v1977_v12 = vpop.f32.mrb[62].mxu0 }
 0x1a6   :  { %1094 = vst [vmem:[#allocation8 + $0x1f0] sm:$0xff] %v673_v7  ;;  %v676_v13 = vadd.f32 %v1977_v12, %v2327_v48  ;;  %v2057_v14 = vpop.f32.mrb[62].mxu1  ;;  %v667_v15 = vpop.f32.mrb[63].mxu0 }
 0x1a7   :  { %1092 = vst [vmem:[#allocation8 + $0x1e0] sm:$0xff] %v665_v10  ;;  %v1785_v16 = vpack.c.bf16 %v2057_v14, %v2056_v8  ;;  %v668_v17 = vadd.f32 %v2327_v48, %v667_v15  ;;  %v1020_v18 = vpop.f32.mrb[63].mxu1 }
 0x1a8   :  { %1095 = vst [vmem:[#allocation8 + $0x1f8] sm:$0xff] %v676_v13  ;;  %v1780_v19 = vpack.c.bf16 %v1020_v18, %v1017_v11 }
 0x1a9   :  { %1817 = vst [vmem:[#allocation9 + $0xf8] sm:$0xff] %v1785_v16   ;;  %1093 = vst [vmem:[#allocation8 + $0x1e8] sm:$0xff] %v668_v17 }
 0x1aa   :  { %1816 = vst [vmem:[#allocation9 + $0xf0] sm:$0xff] %v1780_v19  }
 0x1ab   :  { %2192 = shalt.err (!%p2189_p0)
}
 0x1ac   :  { %s2193_s13 = scalar_lea.hbm %s2431_s4, 8192 }
 0x1ad   :  { %p2194_p1 = scmp.ne.s32.totalorder %s2431_s4, %s2193_s13  ;;  %p2197_p2 = scmp.lt.u32.totalorder %s2193_s13, %s2431_s4 }
 0x1af   :  { %p2199_p3 = pnand %p2197_p2, %p2194_p1 }
 0x1b1   :  { %2202 = shalt.err (!%p2199_p3)
}
 0x1b2   :  { %s2240_s17 = smov 128   ;;  %s2241_s18 = smov 8  }
 0x1b3   :  { %1427 = dma.vmem_to_hbm [thread:$0]  %s1422_s7, 8192, %s2431_s4, [#allocation4], %s2240_s17, %s2240_s17, %s2241_s18  }
 0x1b4   :  { %s2203_s22 = scalar_lea.vmem %s2393_s9, 4096  ;;  %p2208_p5 = scmp.lt.s32.totalorder %s2393_s9, %s2393_s9 }
 0x1b5   :  { %p2204_p4 = scmp.ne.s32.totalorder %s2393_s9, %s2203_s22  ;;  %p2209_p6 = scmp.lt.s32.totalorder %s2203_s22, %s2203_s22 }
 0x1b7   :  { %p2210_p7 = por %p2209_p6, %p2208_p5 }
 0x1b9   :  { %p2211_p8 = pnand %p2210_p7, %p2204_p4 }
 0x1bb   :  { %2214 = shalt.err (!%p2211_p8)
}
 0x1bc   :  { %s2215_s25 = scalar_lea.hbm %s2432_s5, 4096 }
 0x1bd   :  { %p2216_p9 = scmp.ne.s32.totalorder %s2432_s5, %s2215_s25  ;;  %p2219_p10 = scmp.lt.u32.totalorder %s2215_s25, %s2432_s5 }
 0x1bf   :  { %p2221_p11 = pnand %p2219_p10, %p2216_p9 }
 0x1c1   :  { %2224 = shalt.err (!%p2221_p11)
}
 0x1c2   :  { %1439 = dma.vmem_to_hbm [thread:$0]  %s2393_s9, 4096, %s2432_s5, [#allocation10], %s2235_s30, %s2235_s30, %s2236_s6  }
 0x1c3   :  { %2229 = dma.done.wait [#allocation4], 8192  }
 0x1c4   :  { %2230 = vsyncadd [#allocation4], 4294959104 }
 0x1c5   :  { %2231 = dma.done.wait [#allocation10], 4096  }
 0x1c6   :  { %2232 = vsyncadd [#allocation10], 4294963200 }
 0x1c7   :  { %1446 = vsyncpa [#allocation3], 1 }
 0x1c8   :  { %1447 = vsyncpa [#allocation6], 1 }
 0x1c9   :  { %1448 = vsyncpa [#allocation4], 1 }
 0x1ca   :  { %1449 = vsyncpa [#allocation10], 1 }

</bundles_post_ra>
